<compile_context>
chip_gen: v5e
topology: v5e:2x2
jax: 0.10.0
libtpu: 0.0.40
codegen_flags: <defaults>
</compile_context>

<pallas_src>
import numpy as np
import jax
import jax.numpy as jnp
from jax.experimental import pallas as pl
from jax.experimental.pallas import tpu as pltpu


# ----------------------------- kernels --------------------------------------


def _transpose_tile_kernel(x_ref, o_ref):
    # x_ref: (tm, tn) input tile, o_ref: (tn, tm) output tile (batch dim squeezed).
    # tm is a multiple of 128 -> lane-dense output stores. The .T lowers to XLU
    # vxpose, which is far from the bottleneck for a memory-bound transpose.
    o_ref[...] = x_ref[...].T


def _copy_tile_kernel(x_ref, o_ref):
    # Pure copy: the permutation is done by the BlockSpec index maps.
    o_ref[...] = x_ref[...]


# --------------------------- helpers -----------------------------------------


def _decompose_perm(perm):
    """Decompose perm as: identity prefix of length k, swap of two contiguous axis
    groups (first group of size s), and t trailing identity axes.
    Returns (k, s, t); identity returns (n, 0, 0); otherwise None."""
    n = len(perm)
    if perm == tuple(range(n)):
        return (n, 0, 0)
    t = 0
    while t < n and perm[n - 1 - t] == n - 1 - t:
        t += 1
    m = n - t  # perm[:m] is a permutation of range(m) with perm[m-1] != m-1
    k = 0
    while k < m and perm[k] == k:
        k += 1
    rest = list(perm[k:m])
    for s in range(1, m - k):
        expected = list(range(k + s, m)) + list(range(k, k + s))
        if rest == expected:
            return (k, s, t)
    return None


def _hw_budgets():
    """(per-side tile budget bytes, vmem_limit_bytes), gated on physical VMEM so
    v6e-sized tiles are never used on v7x (64 MiB VMEM per TensorCore)."""
    try:
        phys = int(pltpu.get_tpu_info().vmem_capacity_bytes)
    except Exception:
        phys = 64 * 1024 * 1024  # conservative default (v7x per-TC VMEM)
    if phys >= 128 * 1024 * 1024:        # v5e / v6e
        return 8 * 1024 * 1024, 64 * 1024 * 1024
    return 4 * 1024 * 1024, 32 * 1024 * 1024   # v7x


def _pick_tiles(M, N, itemsize, budget_bytes):
    """Tiles for the 2D transpose path (M >= 128 guaranteed): tm a multiple of 128
    (lane-dense output stores), ~budget_bytes per tile side so in+out double-
    buffered stays under the vmem limit on every generation."""
    budget_elems = max(budget_bytes // max(itemsize, 1), 128 * 128)
    tm = min(1024, (M // 128) * 128)
    tn_cap = max(128, (budget_elems // tm) // 128 * 128)
    tn = N if N <= tn_cap else tn_cap
    return tm, tn


def _ordered_grid(extents, base_in_map, base_out_map):
    """Order grid axes by descending extent so the leading (megacore-sharded) axis
    has the largest extent (matters for v7x's 2 TCs when the batch dim is tiny)."""
    order = sorted(range(len(extents)), key=lambda a: -extents[a])
    grid = tuple(extents[a] for a in order)

    def remap(base):
        def index_map(*gidx):
            vals = [None] * len(extents)
            for pos, ax in enumerate(order):
                vals[ax] = gidx[pos]
            return base(*vals)
        return index_map

    return grid, remap(base_in_map), remap(base_out_map)


# --------------------------- pallas paths -------------------------------------


def _permute_transpose2d(x, out_shape, B, M, N, itemsize, tile_budget, vmem_limit):
    tm, tn = _pick_tiles(M, N, itemsize, tile_budget)
    x3 = x.reshape(B, M, N)  # contiguity-preserving (metadata-only) view

    extents = (B, pl.cdiv(M, tm), pl.cdiv(N, tn))
    grid, in_map, out_map = _ordered_grid(
        extents,
        lambda b, i, j: (b, i, j),
        lambda b, i, j: (b, j, i),
    )

    y3 = pl.pallas_call(
        _transpose_tile_kernel,
        out_shape=jax.ShapeDtypeStruct((B, N, M), x.dtype),
        grid=grid,
        in_specs=[pl.BlockSpec((pl.Squeezed(), tm, tn), in_map)],
        out_specs=pl.BlockSpec((pl.Squeezed(), tn, tm), out_map),
        compiler_params=pltpu.CompilerParams(
            dimension_semantics=("parallel",) * len(grid),
            vmem_limit_bytes=vmem_limit,
        ),
        cost_estimate=pl.CostEstimate(
            flops=0, transcendentals=0,
            bytes_accessed=2 * B * M * N * itemsize),
    )(x3)
    return y3.reshape(out_shape)  # metadata-only view


def _permute_blockcopy(x, out_shape, B, M, N, E, itemsize, tile_budget, vmem_limit):
    # Trailing identity axes folded into a contiguous element of size E (E % 128 == 0).
    sub = max(8, 32 // max(itemsize, 1))     # sublane multiple for this dtype
    budget_elems = max(tile_budget // max(itemsize, 1), sub * E)
    tn_cap = max(sub, (budget_elems // E) // sub * sub)
    tn = N if N <= tn_cap else tn_cap

    x4 = x.reshape(B, M, N, E)  # metadata-only view; all movement is in the kernel

    extents = (B, M, pl.cdiv(N, tn))
    grid, in_map, out_map = _ordered_grid(
        extents,
        lambda b, m, j: (b, m, j, 0),
        lambda b, m, j: (b, j, m),
    )

    y3 = pl.pallas_call(
        _copy_tile_kernel,
        out_shape=jax.ShapeDtypeStruct((B, N, M * E), x.dtype),
        grid=grid,
        in_specs=[pl.BlockSpec((pl.Squeezed(), pl.Squeezed(), tn, E), in_map)],
        out_specs=pl.BlockSpec((pl.Squeezed(), tn, E), out_map),
        compiler_params=pltpu.CompilerParams(
            dimension_semantics=("parallel",) * len(grid),
            vmem_limit_bytes=vmem_limit,
        ),
        cost_estimate=pl.CostEstimate(
            flops=0, transcendentals=0,
            bytes_accessed=2 * B * M * N * E * itemsize),
    )(x4)
    return y3.reshape(out_shape)  # metadata-only view


# --------------------------- public wrapper -----------------------------------


def pallas_permute(x, perm):
    """Pallas TPU implementation of torch.Tensor.permute(perm)."""
    perm = tuple(int(p) for p in perm)
    n = x.ndim
    assert sorted(perm) == list(range(n)), "perm must be a permutation of the axes"
    out_shape = tuple(x.shape[p] for p in perm)

    dec = _decompose_perm(perm)
    if dec is None:
        # TODO(synk): permutations that are not "identity prefix + swap of two
        # contiguous groups (+ trailing identity)" are not expressed as a single
        # Pallas kernel here; fall back to XLA's transpose.
        return jnp.transpose(x, perm)
    k, s, t = dec

    if s == 0:
        return x  # identity permutation: zero data movement

    B = int(np.prod(x.shape[:k], dtype=np.int64)) if k > 0 else 1
    M = int(np.prod(x.shape[k:k + s], dtype=np.int64))
    N = int(np.prod(x.shape[k + s:n - t], dtype=np.int64))
    E = int(np.prod(x.shape[n - t:], dtype=np.int64)) if t > 0 else 1

    if B * M * N * E == 0 or M == 1 or N == 1:
        # Swapping with a group of singleton axes is a pure metadata reshape.
        return x.reshape(out_shape)

    itemsize = jnp.dtype(x.dtype).itemsize
    tile_budget, vmem_limit = _hw_budgets()

    if E == 1:
        if M < 128:
            # TODO(synk): lane-dense small-M output needs a (tn, M)->(tn*M/128, 128)
            # in-kernel relayout that Mosaic does not reliably lower; per perf review
            # the masked-store Pallas path is vst-slot bound (~M/128 lane util), so
            # fall back to XLA's transpose for M < 128.
            return jnp.transpose(x, perm)
        return _permute_transpose2d(x, out_shape, B, M, N, itemsize,
                                    tile_budget, vmem_limit)

    if E % 128 != 0:
        # TODO(synk): trailing element size not lane-aligned -> the (tn, E) output
        # block of the (B, N, M*E) view would violate the 128-lane block constraint;
        # fall back to XLA's transpose.
        return jnp.transpose(x, perm)

    return _permute_blockcopy(x, out_shape, B, M, N, E, itemsize,
                              tile_budget, vmem_limit)


# ------------------------------ demo / test ------------------------------------


if __name__ == "__main__":
    key = jax.random.PRNGKey(0)
    k1, k2, k3 = jax.random.split(key, 3)

    # 1) NCHW -> NHWC with enough channels for the lane-dense Pallas transpose path
    #    (C=160 also exercises a partial 128-tile along M -> masked edge block).
    perm_nhwc = (0, 2, 3, 1)
    x1 = jax.random.normal(k1, (2, 160, 16, 16), dtype=jnp.float32)
    o1 = jax.block_until_ready(pallas_permute(x1, perm_nhwc))
    r1 = jnp.transpose(x1, perm_nhwc)
    assert o1.shape == r1.shape and o1.dtype == r1.dtype
    np.testing.assert_array_equal(np.asarray(o1), np.asarray(r1))

    # 2) (B, H, S, D) -> (B, S, H, D): trailing identity axis folded -> pure-copy
    #    Pallas path with lane-dense, contiguous DMA on both streams.
    perm_bshd = (0, 2, 1, 3)
    x2 = jax.random.normal(k2, (2, 4, 8, 128), dtype=jnp.float32)
    o2 = jax.block_until_ready(pallas_permute(x2, perm_bshd))
    r2 = jnp.transpose(x2, perm_bshd)
    assert o2.shape == r2.shape and o2.dtype == r2.dtype
    np.testing.assert_array_equal(np.asarray(o2), np.asarray(r2))

    # 3) Original module config: NCHW -> NHWC with C=4 (small-M -> documented
    #    XLA fallback per the performance review).
    x3 = jax.random.normal(k3, (2, 4, 16, 16), dtype=jnp.float32)
    o3 = jax.block_until_ready(pallas_permute(x3, perm_nhwc))
    r3 = jnp.transpose(x3, perm_nhwc)
    assert o3.shape == r3.shape == (2, 16, 16, 4)
    np.testing.assert_array_equal(np.asarray(o3), np.asarray(r3))

    # 4) Identity permutation: returned as-is (no HBM round trip).
    o4 = jax.block_until_ready(pallas_permute(x3, (0, 1, 2, 3)))
    np.testing.assert_array_equal(np.asarray(o4), np.asarray(x3))

    print("KERNEL_OK")
</pallas_src>

<mosaic_0001>
module attributes {stable_mosaic.version = 11 : i64} {
  func.func @_transpose_tile_kernel(%arg0: i32, %arg1: i32, %arg2: i32, %arg3: memref<1x128x256xf32, #tpu.memory_space<vmem>>, %arg4: memref<1x256x128xf32, #tpu.memory_space<vmem>>) attributes {dimension_semantics = [#tpu.dimension_semantics<parallel>, #tpu.dimension_semantics<parallel>, #tpu.dimension_semantics<parallel>], iteration_bounds = array<i64: 2, 2, 1>, scalar_prefetch = 0 : i64, scratch_operands = 0 : i64, tpu.core_type = #tpu.core_type<tc>, window_params = [{transform_indices = @transform_0, window_bounds = array<i64: 1, 128, 256>}, {transform_indices = @transform_1, window_bounds = array<i64: 1, 256, 128>}]} {
    %c0 = arith.constant 0 : index
    %c0_0 = arith.constant 0 : index
    %c0_1 = arith.constant 0 : index
    %0 = vector.load %arg3[%c0, %c0_0, %c0_1] : memref<1x128x256xf32, #tpu.memory_space<vmem>>, vector<1x128x256xf32>
    %1 = vector.shape_cast %0 : vector<1x128x256xf32> to vector<128x256xf32>
    %2 = tpu.transpose %1, [1, 0] : vector<128x256xf32> -> vector<256x128xf32>
    %c0_2 = arith.constant 0 : index
    %c0_3 = arith.constant 0 : index
    %c0_4 = arith.constant 0 : index
    %3 = vector.load %arg4[%c0_2, %c0_3, %c0_4] : memref<1x256x128xf32, #tpu.memory_space<vmem>>, vector<1x256x128xf32>
    %4 = vector.shape_cast %3 : vector<1x256x128xf32> to vector<256x128xf32>
    %5 = vector.shape_cast %2 : vector<256x128xf32> to vector<1x256x128xf32>
    tpu.vector_store %arg4[%c0_2, %c0_3, %c0_4], %5 {strides = array<i32>} : memref<1x256x128xf32, #tpu.memory_space<vmem>>, vector<1x256x128xf32>,
    return
  }
  func.func @transform_0(%arg0: i32, %arg1: i32, %arg2: i32) -> (i32, i32, i32) {
    %c0_i32 = arith.constant 0 : i32
    return %arg0, %arg1, %arg2 : i32, i32, i32
  }
  func.func @transform_1(%arg0: i32, %arg1: i32, %arg2: i32) -> (i32, i32, i32) {
    %c0_i32 = arith.constant 0 : i32
    return %arg0, %arg2, %arg1 : i32, i32, i32
  }
}

</mosaic_0001>

<bundles_post_ra>
// kernel: tpu_custom_call.1
= control target key start
LH: loop header
LB: loop body
LE: loop exit
PB: predicated region body
PF: predicated region fallthrough
CT: control target
= control target key end

     0   :  { %6 = vsyncpa [#allocation3], 0  ;;  %s1068_s0 = inlined_call_operand.hbm [shape: f32[2,160,256], index: 0, kind: input, shape index: {}]   ;;  %s1069_s1 = inlined_call_operand.vmem [shape: f32[2,256,160], index: 1, kind: output, shape index: {}]  }
   0x1   :  { %8 = vsyncpa [#allocation3 + $0x1], 0  ;;  %s776_s6 = smov 0   ;;  %s778_s7 = smov 0  }
   0x2   :  { %s780_s8 = smov 0   ;;  %s782_s9 = smov 0  }
   0x3   :  { %s784_s10 = smov 0   ;;  %s786_s11 = smov 0  }
   0x4   :  { %s788_s12 = smov 0   ;;  %s790_s13 = smov 0  }
   0x5 LB: > { %s29_s14 = sadd.s32 1, %s753_s11  ;;  %s33_s15 = sadd.s32 1, %s757_s12  ;;  %s761_s13 = sphi %s790_s13, %s14_s13   ;;  %s757_s12 = sphi %s788_s12, %s1079_s12   ;;  %s753_s11 = sphi %s786_s11, %s1078_s11   ;;  %s749_s10 = sphi %s784_s10, %s1077_s10   ;;  %s745_s9 = sphi %s782_s9, %s1076_s9   ;;  %s741_s8 = sphi %s780_s8, %s1075_s8   ;;  %s737_s7 = sphi %s778_s7, %s1074_s7   ;;  %s733_s6 = sphi %s776_s6, %s1073_s6  }
   0x6   : > { %p31_p0 = scmp.ge.s32.totalorder %s29_s14, 2  ;;  %s565_s16 = sadd.s32 4294967295, %s761_s13  }
   0x7   : > { %p51_p1 = scmp.ne.s32.totalorder %s741_s8, %s737_s7  ;;  %p52_p2 = scmp.eq.s32.totalorder %s761_s13, 0 }
   0x8   : > { %s1081_s14 = smov (%p31_p0, %s29_s14), 0  ;;  %s1083_s15 = smov (!%p31_p0, %s33_s15), %s757_s12 }
   0x9   : > { %s38_s17 = ssub.s32 %s753_s11, %s1081_s14  ;;  %p35_p3 = scmp.ge.s32.totalorder %s1083_s15, 2 }
   0xa   : > { %p57_p4 = scmp.ne.s32.totalorder %s737_s7, %s733_s6  ;;  %p53_p5 = por %p52_p2, %p51_p1 }
   0xb   : > { %p58_p6 = scmp.eq.s32.totalorder %s565_s16, 0  ;;  %s1085_s15 = smov (%p35_p3, %s1083_s15), 0 }
   0xc   : > { %p85_p8 = scmp.eq.s32.totalorder %s565_s16, 3  ;;  %s37_s19 = ssub.s32 %s757_s12, %s1085_s15 }
   0xd   : > { %p831_p7 = por %p58_p6, %p57_p4  ;;  %s44_s20 = sadd.s32 1, %s741_s8 }
   0xe   : > { %s39_s21 = sor.u32 %s38_s17, %s37_s19  ;;  %p841_p9 = por %p85_p8, %p51_p1 }
   0xf   : > { %p42_p10 = scmp.eq.s32.totalorder %s39_s21, 0  ;;  %p568_p11 = scmp.ge.s32.totalorder %s761_s13, 4 }
  0x11   : > { %s846_s23 = scalar_select %p42_p10, %s741_s8, %s44_s20  }
  0x12   : > { %107 = sbr.rel (%p568_p11) target bundleno = 62 (0x3e), region = 16 }
  0x17   : > { %110 = sbr.rel (!%p53_p5) target bundleno = 62 (0x3e), region = 20  ;;  %s111_s24 = sand.u32 (%p53_p5), 1, %s741_s8  }
  0x18   : > { %s570_s25 = sshll.u32 (%p53_p5), %s753_s11, 4  ;;  %s569_s26 = sshll.u32 (%p53_p5), %s111_s24, 8 }
  0x19   : > { %s118_s27 = ssub.s32 (%p53_p5), 20, %s570_s25  ;;  %s854_s2 = scalar_lea.sflag (%p53_p5), [#allocation3], %s111_s24 }
  0x1a   : > { %p119_p12 = scmp.lt.s32.totalorder (%p53_p5), %s118_s27, 16  ;;  %s115_s3 = scalar_lea.vmem (%p53_p5), [#allocation2], %s569_s26 }
  0x1c   : > { %s1087_s27 = smov (!%p119_p12, %s118_s27), 16 }
  0x1d   : > { %s586_s28 = sshll.u32 %s1087_s27, 4 }
  0x1e   : > { %s123_s29 = ssub.s32 256, %s586_s28 }
  0x1f   : > { %s124_s30 = sshll.u32 %s123_s29, 4 }
  0x20   : > { %125 = vsyncadd %s854_s2, %s124_s30  ;;  %s587_s4 = sshll.u32 %s753_s11, 5  ;;  %s588_s5 = smul.u32 40, %s757_s12 }
  0x21   : > { %s859_s6 = sshll.u32 %s115_s3, 4  ;;  %p861_p13 = scmp.ne.s32.totalorder %s586_s28, 0  ;;  %s137_s6 = int_to_ptr.vmem [resolvable:$true] %s859_s6 }
  0x22   : > { %s130_s17 = sadd.s32 %s588_s5, %s587_s4  ;;  %s577_s19 = sshll.u32 %s1087_s27, 8 }
  0x23   : > { %s575_s20 = sshll.u32 %s130_s17, 3  ;;  %s658_s28 = sshrl.u32 %s577_s19, 4 }
  0x24   : > { %s132_s25 = scalar_lea.hbm %s1068_s0, %s575_s20  ;;  %s667_s5 = scalar_lea.hbm %s1068_s0, 640 }
  0x25   : > { %s134_s26 = sshll.u32 %s132_s25, 4  ;;  %s870_s26 = int_to_ptr.hbm [resolvable:$true] %s134_s26 }
  0x26   : > { %s656_s29 = sshra.s32 %s870_s26, 4  ;;  %s657_s29 = int_to_ptr.hbm [resolvable:$true] %s656_s29 }
  0x27   : > { %s663_s30 = scalar_lea.hbm %s657_s29, %s658_s28 }
  0x28   : > { %p664_p0 = scmp.ne.s32.totalorder %s657_s29, %s663_s30  ;;  %p669_p3 = scmp.lt.s32.totalorder %s667_s5, %s663_s30 }
  0x2a   : > { %p665_p1 = pnand %p664_p0, %p861_p13 }
  0x2c   : > { %p666_p2 = pneg %p665_p1 }
  0x2e   : > { %p671_p4 = pnand %p669_p3, %p666_p2 }
  0x30   : > { %674 = shalt.err (!%p671_p4)
}
  0x31   : > { %s675_s17 = sshra.s32 %s137_s6, 4  ;;  %s763_s21 = smov [#allocation2]   ;;  %s676_s17 = int_to_ptr.vmem [resolvable:$true] %s675_s17 }
  0x32   : > { %s682_s20 = scalar_lea.vmem %s676_s17, %s658_s28  ;;  %s686_s24 = scalar_lea.vmem %s763_s21, 512 }
  0x33   : > { %p683_p5 = scmp.ne.s32.totalorder %s676_s17, %s682_s20  ;;  %p688_p10 = scmp.lt.s32.totalorder %s686_s24, %s682_s20 }
  0x35   : > { %p684_p6 = pnand %p683_p5, %p861_p13 }
  0x37   : > { %p685_p8 = pneg %p684_p6 }
  0x39   : > { %p690_p11 = pnand %p688_p10, %p685_p8 }
  0x3b   : > { %693 = shalt.err (!%p690_p11)
}
  0x3c   : > { %s764_s25 = smov 256   ;;  %s765_s29 = smov 16  }
  0x3d   : > { %142 = dma.hbm_to_vmem [thread:$0]  (%p861_p13), %s870_s26, %s577_s19, %s137_s6, %s854_s2, %s764_s25, %s764_s25, %s765_s29  }
  0x3e PF: > { %p578_p12 = scmp.ge.s32.totalorder %s761_s13, 1  ;;  %p144_p0 = scmp.lt.s32.totalorder %s761_s13, 5 }
  0x40   : > { %p145_p1 = pnand %p578_p12, %p144_p0 }
  0x41   : > { %s150_s28 = sand.u32 (!%p145_p1), 1, %s737_s7  }
  0x42   : > { %148 = sbr.rel (%p145_p1) target bundleno = 368 (0x170), region = 24  ;;  %s895_s30 = sshll.u32 (!%p145_p1), %s150_s28, 8 }
  0x43   : > { %s151_s3 = scalar_lea.sflag (!%p145_p1), [#allocation3], %s150_s28  ;;  %s898_s4 = scalar_lea.vmem (!%p145_p1), [#allocation2], %s895_s30 }
  0x47   : > { %728 = dma.done.wait (%p831_p7), %s151_s3, 4096  }
  0x48   : > { %730 = vsyncadd (%p831_p7), %s151_s3, 4294963200  ;;  %v182_v0 = vld [vmem:[%s898_s4 + $0x8] sm:$0xff]  ;;  %v181_v1 = vld [vmem:[%s898_s4] sm:$0xff]  ;;  %s937_s18 = scalar_lea.vmem [#allocation4], %s895_s30  ;;  %s582_s27 = sshll.u32 (%p841_p9), %s749_s10, 6 }
  0x49   : > { %245 = vxpose.xlu1.b32.start [1/16] %v182_v0, 128  ;;  %213 = vxpose.xlu0.b32.start [1/16] %v181_v1, 128  ;;  %v184_v2 = vld [vmem:[%s898_s4 + $0x18] sm:$0xff]  ;;  %v183_v3 = vld [vmem:[%s898_s4 + $0x10] sm:$0xff]  ;;  %v186_v4 = vld [vmem:[%s898_s4 + $0x28] sm:$0xff]  ;;  %s320_s2 = sadd.s32 (%p841_p9), %s745_s9, %s582_s27 }
  0x4a   : > { %v185_v5 = vld [vmem:[%s898_s4 + $0x20] sm:$0xff]  ;;  %v188_v6 = vld [vmem:[%s898_s4 + $0x38] sm:$0xff]  ;;  %v187_v7 = vld [vmem:[%s898_s4 + $0x30] sm:$0xff]  ;;  %s583_s6 = sshll.u32 (%p841_p9), %s320_s2, 3 }
  0x4b   : > { %v190_v8 = vld [vmem:[%s898_s4 + $0x48] sm:$0xff]  ;;  %v189_v9 = vld [vmem:[%s898_s4 + $0x40] sm:$0xff]  ;;  %v192_v10 = vld [vmem:[%s898_s4 + $0x58] sm:$0xff]  ;;  %s980_s22 = scalar_lea.vmem (%p841_p9), %s1069_s1, %s583_s6 }
  0x4c   : > { %v191_v11 = vld [vmem:[%s898_s4 + $0x50] sm:$0xff]  ;;  %v194_v12 = vld [vmem:[%s898_s4 + $0x68] sm:$0xff]  ;;  %v193_v13 = vld [vmem:[%s898_s4 + $0x60] sm:$0xff] }
  0x4d   : > { %v196_v14 = vld [vmem:[%s898_s4 + $0x78] sm:$0xff]  ;;  %v195_v15 = vld [vmem:[%s898_s4 + $0x70] sm:$0xff]  ;;  %v198_v16 = vld [vmem:[%s898_s4 + $0x88] sm:$0xff] }
  0x4e   : > { %v197_v17 = vld [vmem:[%s898_s4 + $0x80] sm:$0xff]  ;;  %v200_v18 = vld [vmem:[%s898_s4 + $0x98] sm:$0xff]  ;;  %v199_v19 = vld [vmem:[%s898_s4 + $0x90] sm:$0xff] }
  0x4f   : > { %v202_v20 = vld [vmem:[%s898_s4 + $0xa8] sm:$0xff]  ;;  %v201_v21 = vld [vmem:[%s898_s4 + $0xa0] sm:$0xff]  ;;  %v204_v22 = vld [vmem:[%s898_s4 + $0xb8] sm:$0xff] }
  0x50   : > { %v203_v23 = vld [vmem:[%s898_s4 + $0xb0] sm:$0xff]  ;;  %v206_v24 = vld [vmem:[%s898_s4 + $0xc8] sm:$0xff]  ;;  %v205_v25 = vld [vmem:[%s898_s4 + $0xc0] sm:$0xff] }
  0x51   : > { %246 = vxpose.xlu1.b32.cont [2/16] %v184_v2, 128  ;;  %214 = vxpose.xlu0.b32.cont [2/16] %v183_v3, 128  ;;  %v208_v26 = vld [vmem:[%s898_s4 + $0xd8] sm:$0xff]  ;;  %v207_v27 = vld [vmem:[%s898_s4 + $0xd0] sm:$0xff]  ;;  %v210_v28 = vld [vmem:[%s898_s4 + $0xe8] sm:$0xff] }
  0x52   : > { %v209_v29 = vld [vmem:[%s898_s4 + $0xe0] sm:$0xff]  ;;  %v212_v30 = vld [vmem:[%s898_s4 + $0xf8] sm:$0xff]  ;;  %v211_v31 = vld [vmem:[%s898_s4 + $0xf0] sm:$0xff] }
  0x59   : > { %247 = vxpose.xlu1.b32.cont [3/16] %v186_v4, 128  ;;  %215 = vxpose.xlu0.b32.cont [3/16] %v185_v5, 128 }
  0x61   : > { %248 = vxpose.xlu1.b32.cont [4/16] %v188_v6, 128  ;;  %216 = vxpose.xlu0.b32.cont [4/16] %v187_v7, 128 }
  0x69   : > { %249 = vxpose.xlu1.b32.cont [5/16] %v190_v8, 128  ;;  %217 = vxpose.xlu0.b32.cont [5/16] %v189_v9, 128 }
  0x71   : > { %250 = vxpose.xlu1.b32.cont [6/16] %v192_v10, 128  ;;  %218 = vxpose.xlu0.b32.cont [6/16] %v191_v11, 128 }
  0x79   : > { %251 = vxpose.xlu1.b32.cont [7/16] %v194_v12, 128  ;;  %219 = vxpose.xlu0.b32.cont [7/16] %v193_v13, 128 }
  0x81   : > { %252 = vxpose.xlu1.b32.cont [8/16] %v196_v14, 128  ;;  %220 = vxpose.xlu0.b32.cont [8/16] %v195_v15, 128 }
  0x89   : > { %253 = vxpose.xlu1.b32.cont [9/16] %v198_v16, 128  ;;  %221 = vxpose.xlu0.b32.cont [9/16] %v197_v17, 128 }
  0x91   : > { %254 = vxpose.xlu1.b32.cont [10/16] %v200_v18, 128  ;;  %222 = vxpose.xlu0.b32.cont [10/16] %v199_v19, 128 }
  0x99   : > { %255 = vxpose.xlu1.b32.cont [11/16] %v202_v20, 128  ;;  %223 = vxpose.xlu0.b32.cont [11/16] %v201_v21, 128 }
  0xa1   : > { %256 = vxpose.xlu1.b32.cont [12/16] %v204_v22, 128  ;;  %224 = vxpose.xlu0.b32.cont [12/16] %v203_v23, 128 }
  0xa9   : > { %257 = vxpose.xlu1.b32.cont [13/16] %v206_v24, 128  ;;  %225 = vxpose.xlu0.b32.cont [13/16] %v205_v25, 128 }
  0xb1   : > { %258 = vxpose.xlu1.b32.cont [14/16] %v208_v26, 128  ;;  %226 = vxpose.xlu0.b32.cont [14/16] %v207_v27, 128 }
  0xb9   : > { %259 = vxpose.xlu1.b32.cont [15/16] %v210_v28, 128  ;;  %227 = vxpose.xlu0.b32.cont [15/16] %v209_v29, 128 }
  0xc1   : > { %260 = vxpose.xlu1.b32.end [16/16] %v212_v30, 128  ;;  %228 = vxpose.xlu0.b32.end [16/16] %v211_v31, 128 }
  0xed   : > { %v261_v32 = vpop.trf.xlu1  ;;  %v229_v33 = vpop.trf.xlu0 }
  0xee   : > { %293 = vst [vmem:[%s937_s18 + $0x80] sm:$0xff] %v261_v32 }
  0xef   : > { %277 = vst [vmem:[%s937_s18] sm:$0xff] %v229_v33 }
  0xf5   : > { %v262_v34 = vpop.trf.xlu1  ;;  %v230_v35 = vpop.trf.xlu0  ;;  %v445_v16 = vld [vmem:[%s937_s18 + $0x80] sm:$0xff] (%p841_p9) }
  0xf6   : > { %294 = vst [vmem:[%s937_s18 + $0x88] sm:$0xff] %v262_v34  ;;  %v413_v0 = vld [vmem:[%s937_s18] sm:$0xff] (%p841_p9) }
  0xf7   : > { %278 = vst [vmem:[%s937_s18 + $0x8] sm:$0xff] %v230_v35 }
  0xf8   : > { %414 = vst [vmem:[%s980_s22] sm:$0xff] (%p841_p9), %v413_v0 }
  0xf9   : > { %446 = vst [vmem:[%s980_s22 + $0x100] sm:$0xff] (%p841_p9), %v445_v16 }
  0xfd   : > { %v263_v36 = vpop.trf.xlu1  ;;  %v231_v37 = vpop.trf.xlu0  ;;  %v447_v17 = vld [vmem:[%s937_s18 + $0x88] sm:$0xff] (%p841_p9) }
  0xfe   : > { %295 = vst [vmem:[%s937_s18 + $0x90] sm:$0xff] %v263_v36  ;;  %v415_v1 = vld [vmem:[%s937_s18 + $0x8] sm:$0xff] (%p841_p9) }
  0xff   : > { %279 = vst [vmem:[%s937_s18 + $0x10] sm:$0xff] %v231_v37 }
 0x100   : > { %416 = vst [vmem:[%s980_s22 + $0x10] sm:$0xff] (%p841_p9), %v415_v1 }
 0x101   : > { %448 = vst [vmem:[%s980_s22 + $0x110] sm:$0xff] (%p841_p9), %v447_v17 }
 0x105   : > { %v264_v38 = vpop.trf.xlu1  ;;  %v232_v39 = vpop.trf.xlu0  ;;  %v449_v18 = vld [vmem:[%s937_s18 + $0x90] sm:$0xff] (%p841_p9) }
 0x106   : > { %296 = vst [vmem:[%s937_s18 + $0x98] sm:$0xff] %v264_v38  ;;  %v417_v2 = vld [vmem:[%s937_s18 + $0x10] sm:$0xff] (%p841_p9) }
 0x107   : > { %280 = vst [vmem:[%s937_s18 + $0x18] sm:$0xff] %v232_v39 }
 0x108   : > { %418 = vst [vmem:[%s980_s22 + $0x20] sm:$0xff] (%p841_p9), %v417_v2 }
 0x109   : > { %450 = vst [vmem:[%s980_s22 + $0x120] sm:$0xff] (%p841_p9), %v449_v18 }
 0x10d   : > { %v265_v40 = vpop.trf.xlu1  ;;  %v233_v41 = vpop.trf.xlu0  ;;  %v451_v19 = vld [vmem:[%s937_s18 + $0x98] sm:$0xff] (%p841_p9) }
 0x10e   : > { %297 = vst [vmem:[%s937_s18 + $0xa0] sm:$0xff] %v265_v40  ;;  %v419_v3 = vld [vmem:[%s937_s18 + $0x18] sm:$0xff] (%p841_p9) }
 0x10f   : > { %281 = vst [vmem:[%s937_s18 + $0x20] sm:$0xff] %v233_v41 }
 0x110   : > { %420 = vst [vmem:[%s980_s22 + $0x30] sm:$0xff] (%p841_p9), %v419_v3 }
 0x111   : > { %452 = vst [vmem:[%s980_s22 + $0x130] sm:$0xff] (%p841_p9), %v451_v19 }
 0x115   : > { %v266_v42 = vpop.trf.xlu1  ;;  %v234_v43 = vpop.trf.xlu0  ;;  %v453_v20 = vld [vmem:[%s937_s18 + $0xa0] sm:$0xff] (%p841_p9) }
 0x116   : > { %298 = vst [vmem:[%s937_s18 + $0xa8] sm:$0xff] %v266_v42  ;;  %v421_v4 = vld [vmem:[%s937_s18 + $0x20] sm:$0xff] (%p841_p9) }
 0x117   : > { %282 = vst [vmem:[%s937_s18 + $0x28] sm:$0xff] %v234_v43 }
 0x118   : > { %422 = vst [vmem:[%s980_s22 + $0x40] sm:$0xff] (%p841_p9), %v421_v4 }
 0x119   : > { %454 = vst [vmem:[%s980_s22 + $0x140] sm:$0xff] (%p841_p9), %v453_v20 }
 0x11d   : > { %v267_v44 = vpop.trf.xlu1  ;;  %v235_v45 = vpop.trf.xlu0  ;;  %v455_v21 = vld [vmem:[%s937_s18 + $0xa8] sm:$0xff] (%p841_p9) }
 0x11e   : > { %299 = vst [vmem:[%s937_s18 + $0xb0] sm:$0xff] %v267_v44  ;;  %v423_v5 = vld [vmem:[%s937_s18 + $0x28] sm:$0xff] (%p841_p9) }
 0x11f   : > { %283 = vst [vmem:[%s937_s18 + $0x30] sm:$0xff] %v235_v45 }
 0x120   : > { %424 = vst [vmem:[%s980_s22 + $0x50] sm:$0xff] (%p841_p9), %v423_v5 }
 0x121   : > { %456 = vst [vmem:[%s980_s22 + $0x150] sm:$0xff] (%p841_p9), %v455_v21 }
 0x125   : > { %v268_v46 = vpop.trf.xlu1  ;;  %v236_v47 = vpop.trf.xlu0  ;;  %v457_v22 = vld [vmem:[%s937_s18 + $0xb0] sm:$0xff] (%p841_p9) }
 0x126   : > { %300 = vst [vmem:[%s937_s18 + $0xb8] sm:$0xff] %v268_v46  ;;  %v425_v6 = vld [vmem:[%s937_s18 + $0x30] sm:$0xff] (%p841_p9) }
 0x127   : > { %284 = vst [vmem:[%s937_s18 + $0x38] sm:$0xff] %v236_v47 }
 0x128   : > { %426 = vst [vmem:[%s980_s22 + $0x60] sm:$0xff] (%p841_p9), %v425_v6 }
 0x129   : > { %458 = vst [vmem:[%s980_s22 + $0x160] sm:$0xff] (%p841_p9), %v457_v22 }
 0x12d   : > { %v269_v48 = vpop.trf.xlu1  ;;  %v237_v49 = vpop.trf.xlu0  ;;  %v459_v23 = vld [vmem:[%s937_s18 + $0xb8] sm:$0xff] (%p841_p9) }
 0x12e   : > { %301 = vst [vmem:[%s937_s18 + $0xc0] sm:$0xff] %v269_v48  ;;  %v427_v7 = vld [vmem:[%s937_s18 + $0x38] sm:$0xff] (%p841_p9) }
 0x12f   : > { %285 = vst [vmem:[%s937_s18 + $0x40] sm:$0xff] %v237_v49 }
 0x130   : > { %428 = vst [vmem:[%s980_s22 + $0x70] sm:$0xff] (%p841_p9), %v427_v7 }
 0x131   : > { %460 = vst [vmem:[%s980_s22 + $0x170] sm:$0xff] (%p841_p9), %v459_v23 }
 0x135   : > { %v270_v50 = vpop.trf.xlu1  ;;  %v238_v51 = vpop.trf.xlu0  ;;  %v461_v24 = vld [vmem:[%s937_s18 + $0xc0] sm:$0xff] (%p841_p9) }
 0x136   : > { %302 = vst [vmem:[%s937_s18 + $0xc8] sm:$0xff] %v270_v50  ;;  %v429_v8 = vld [vmem:[%s937_s18 + $0x40] sm:$0xff] (%p841_p9) }
 0x137   : > { %286 = vst [vmem:[%s937_s18 + $0x48] sm:$0xff] %v238_v51 }
 0x138   : > { %430 = vst [vmem:[%s980_s22 + $0x80] sm:$0xff] (%p841_p9), %v429_v8 }
 0x139   : > { %462 = vst [vmem:[%s980_s22 + $0x180] sm:$0xff] (%p841_p9), %v461_v24 }
 0x13d   : > { %v271_v52 = vpop.trf.xlu1  ;;  %v239_v53 = vpop.trf.xlu0  ;;  %v463_v25 = vld [vmem:[%s937_s18 + $0xc8] sm:$0xff] (%p841_p9) }
 0x13e   : > { %303 = vst [vmem:[%s937_s18 + $0xd0] sm:$0xff] %v271_v52  ;;  %v431_v9 = vld [vmem:[%s937_s18 + $0x48] sm:$0xff] (%p841_p9) }
 0x13f   : > { %287 = vst [vmem:[%s937_s18 + $0x50] sm:$0xff] %v239_v53 }
 0x140   : > { %432 = vst [vmem:[%s980_s22 + $0x90] sm:$0xff] (%p841_p9), %v431_v9 }
 0x141   : > { %464 = vst [vmem:[%s980_s22 + $0x190] sm:$0xff] (%p841_p9), %v463_v25 }
 0x145   : > { %v272_v54 = vpop.trf.xlu1  ;;  %v240_v55 = vpop.trf.xlu0  ;;  %v465_v26 = vld [vmem:[%s937_s18 + $0xd0] sm:$0xff] (%p841_p9) }
 0x146   : > { %304 = vst [vmem:[%s937_s18 + $0xd8] sm:$0xff] %v272_v54  ;;  %v433_v10 = vld [vmem:[%s937_s18 + $0x50] sm:$0xff] (%p841_p9) }
 0x147   : > { %288 = vst [vmem:[%s937_s18 + $0x58] sm:$0xff] %v240_v55 }
 0x148   : > { %434 = vst [vmem:[%s980_s22 + $0xa0] sm:$0xff] (%p841_p9), %v433_v10 }
 0x149   : > { %466 = vst [vmem:[%s980_s22 + $0x1a0] sm:$0xff] (%p841_p9), %v465_v26 }
 0x14d   : > { %v273_v56 = vpop.trf.xlu1  ;;  %v241_v57 = vpop.trf.xlu0  ;;  %v467_v27 = vld [vmem:[%s937_s18 + $0xd8] sm:$0xff] (%p841_p9) }
 0x14e   : > { %305 = vst [vmem:[%s937_s18 + $0xe0] sm:$0xff] %v273_v56  ;;  %v435_v11 = vld [vmem:[%s937_s18 + $0x58] sm:$0xff] (%p841_p9) }
 0x14f   : > { %289 = vst [vmem:[%s937_s18 + $0x60] sm:$0xff] %v241_v57 }
 0x150   : > { %436 = vst [vmem:[%s980_s22 + $0xb0] sm:$0xff] (%p841_p9), %v435_v11 }
 0x151   : > { %468 = vst [vmem:[%s980_s22 + $0x1b0] sm:$0xff] (%p841_p9), %v467_v27 }
 0x155   : > { %v274_v58 = vpop.trf.xlu1  ;;  %v242_v59 = vpop.trf.xlu0  ;;  %v469_v28 = vld [vmem:[%s937_s18 + $0xe0] sm:$0xff] (%p841_p9) }
 0x156   : > { %306 = vst [vmem:[%s937_s18 + $0xe8] sm:$0xff] %v274_v58  ;;  %v437_v12 = vld [vmem:[%s937_s18 + $0x60] sm:$0xff] (%p841_p9) }
 0x157   : > { %290 = vst [vmem:[%s937_s18 + $0x68] sm:$0xff] %v242_v59 }
 0x158   : > { %438 = vst [vmem:[%s980_s22 + $0xc0] sm:$0xff] (%p841_p9), %v437_v12 }
 0x159   : > { %470 = vst [vmem:[%s980_s22 + $0x1c0] sm:$0xff] (%p841_p9), %v469_v28 }
 0x15d   : > { %v275_v60 = vpop.trf.xlu1  ;;  %v243_v61 = vpop.trf.xlu0  ;;  %v471_v29 = vld [vmem:[%s937_s18 + $0xe8] sm:$0xff] (%p841_p9) }
 0x15e   : > { %307 = vst [vmem:[%s937_s18 + $0xf0] sm:$0xff] %v275_v60  ;;  %v439_v13 = vld [vmem:[%s937_s18 + $0x68] sm:$0xff] (%p841_p9) }
 0x15f   : > { %291 = vst [vmem:[%s937_s18 + $0x70] sm:$0xff] %v243_v61 }
 0x160   : > { %440 = vst [vmem:[%s980_s22 + $0xd0] sm:$0xff] (%p841_p9), %v439_v13 }
 0x161   : > { %472 = vst [vmem:[%s980_s22 + $0x1d0] sm:$0xff] (%p841_p9), %v471_v29 }
 0x163   : > { %315 = sbr.rel (!%p841_p9) target bundleno = 368 (0x170), region = 32 }
 0x165   : > { %v276_v62 = vpop.trf.xlu1  ;;  %v244_v63 = vpop.trf.xlu0  ;;  %v473_v30 = vld [vmem:[%s937_s18 + $0xf0] sm:$0xff] (%p841_p9) }
 0x166   : > { %308 = vst [vmem:[%s937_s18 + $0xf8] sm:$0xff] %v276_v62  ;;  %v441_v14 = vld [vmem:[%s937_s18 + $0x70] sm:$0xff] (%p841_p9) }
 0x167   : > { %292 = vst [vmem:[%s937_s18 + $0x78] sm:$0xff] %v244_v63 }
 0x168   : > { %442 = vst [vmem:[%s980_s22 + $0xe0] sm:$0xff] %v441_v14 }
 0x169   : > { %474 = vst [vmem:[%s980_s22 + $0x1e0] sm:$0xff] %v473_v30 }
 0x16d   : > { %v475_v31 = vld [vmem:[%s937_s18 + $0xf8] sm:$0xff] }
 0x16e   : > { %v443_v15 = vld [vmem:[%s937_s18 + $0x78] sm:$0xff]  ;;  %476 = vst [vmem:[%s980_s22 + $0x1f0] sm:$0xff] %v475_v31 }
 0x16f   : > { %444 = vst [vmem:[%s980_s22 + $0xf0] sm:$0xff] %v443_v15 }
 0x170 PF: > { %s14_s13 = sadd.s32 1, %s761_s13   ;;  %s1073_s6 = smov %s737_s7 }
 0x171   : > { %p11_p7 = scmp.ge.s32.totalorder %s14_s13, 6   ;;  %s1074_s7 = smov %s741_s8 }
 0x172   : > { %s1075_s8 = smov %s846_s23  ;;  %s1076_s9 = smov %s753_s11 }
 0x173   : > { %s1077_s10 = smov %s757_s12  ;;  %s1078_s11 = smov %s1081_s14 }
 0x174   : > { %s1079_s12 = smov %s1085_s15  ;;  %13 = sbr.rel (!%p11_p7) target bundleno = 5 (0x5), region = 102 }
 0x179   :  { %492 = vsyncpa [#allocation3], 1 }
 0x17a   :  { %494 = vsyncpa [#allocation3 + $0x1], 1 }

</bundles_post_ra>
